<compile_context>
chip_gen: v7x
topology: tpu7x:2x2x1
jax: 0.10.0
libtpu: 0.0.40
codegen_flags: <defaults>
</compile_context>

<pallas_src>
import jax
import jax.numpy as jnp
from jax.experimental import pallas as pl
from jax.experimental.pallas import tpu as pltpu

_LANE = 128
_SUBLANE = 8


def _round_up(x, m):
    return ((x + m - 1) // m) * m


def _catm_hgn_kernel(nodes_smem, feat_hbm, w_ref, out_ref, emb_buf, copy_sems):
    """One grid step over a tile of TN nodes.

    1) Fused encoder gather: DMA each node's feature row HBM -> VMEM scratch.
    2) Classifier matmul on the MXU: out_tile = embeds_tile @ w_t, with w_t
       already (D, C_pad) so there is no transpose / XLU traffic in the body.
    """
    i = pl.program_id(0)
    tile_n = emb_buf.shape[0]

    # --- fused encoder gather (per-row DMA, data-dependent indices) ---------
    @pl.loop(0, tile_n)
    def _issue(r):
        node = nodes_smem[i * tile_n + r]
        pltpu.make_async_copy(
            feat_hbm.at[pl.ds(node, 1)], emb_buf.at[pl.ds(r, 1)], copy_sems.at[r]
        ).start()

    @pl.loop(0, tile_n)
    def _wait(r):
        pltpu.make_async_copy(
            feat_hbm.at[pl.ds(0, 1)], emb_buf.at[pl.ds(r, 1)], copy_sems.at[r]
        ).wait()

    # --- classifier matmul, f32 accumulation, lane-dense (TN, 128) store ----
    out_ref[...] = jnp.dot(
        emb_buf[...], w_ref[...], preferred_element_type=jnp.float32
    ).astype(out_ref.dtype)


def catm_hgn_forward(nodes, feat_table, weight, *, tile_n=512):
    """scores = (weight @ enc(nodes).T).T == enc(nodes) @ weight.T, shape (N, C)."""
    nodes = nodes.astype(jnp.int32)
    n = nodes.shape[0]
    _, d = feat_table.shape
    c, d2 = weight.shape
    assert d == d2

    c_pad = _round_up(c, _LANE)

    # Pre-transpose + zero-pad the classifier weight once: (C, D) -> (D, C_pad).
    # Keeps D on the contraction axis (no in-kernel .T) and makes output stores
    # full 128-lane wide.  Padded columns are zero, so they are sliced off below.
    w_t = jnp.zeros((d, c_pad), weight.dtype).at[:, :c].set(weight.T)

    # Tile over nodes; pad N so every grid step handles a full tile.
    tile_n = max(_SUBLANE, min(tile_n, _round_up(n, _SUBLANE)))
    n_pad = _round_up(n, tile_n)
    nodes_padded = jnp.zeros((n_pad,), jnp.int32).at[:n].set(nodes)

    grid = (n_pad // tile_n,)
    out_dtype = feat_table.dtype  # NOTE: bf16 inputs also fine (f32 MXU accumulation)

    itemsize = jnp.dtype(feat_table.dtype).itemsize
    cost = pl.CostEstimate(
        flops=2 * n_pad * d * c_pad,
        transcendentals=0,
        bytes_accessed=(
            n_pad * d * itemsize                       # gathered embeddings
            + d * c_pad * jnp.dtype(weight.dtype).itemsize
            + n_pad * c_pad * jnp.dtype(out_dtype).itemsize
        ),
    )

    scores_padded = pl.pallas_call(
        _catm_hgn_kernel,
        out_shape=jax.ShapeDtypeStruct((n_pad, c_pad), out_dtype),
        grid_spec=pltpu.PrefetchScalarGridSpec(
            num_scalar_prefetch=1,            # nodes -> SMEM, drives the DMA gather
            grid=grid,
            in_specs=[
                pl.BlockSpec(memory_space=pl.ANY),                       # feat table stays in HBM
                pl.BlockSpec((d, c_pad), lambda i, nodes_ref: (0, 0)),   # weight resident in VMEM
            ],
            out_specs=pl.BlockSpec((tile_n, c_pad), lambda i, nodes_ref: (i, 0)),
            scratch_shapes=[
                pltpu.VMEM((tile_n, d), feat_table.dtype),   # gathered embeddings tile
                pltpu.SemaphoreType.DMA((tile_n,)),          # one sem per row DMA
            ],
        ),
        compiler_params=pltpu.CompilerParams(
            dimension_semantics=("parallel",),     # shard N tiles across TCs (v7x megacore)
            vmem_limit_bytes=32 * 1024 * 1024,     # explicit; safe on v5e/v6e/v7x
        ),
        cost_estimate=cost,
    )(nodes_padded, feat_table, w_t)

    # Slice away N padding and the zero-padded class columns.
    return scores_padded[:n, :c]


def xavier_uniform(key, shape, dtype=jnp.float32):
    # PyTorch init.xavier_uniform_ for a 2D (fan_out, fan_in) weight.
    fan_out, fan_in = shape
    limit = (6.0 / (fan_in + fan_out)) ** 0.5
    return jax.random.uniform(key, shape, dtype, minval=-limit, maxval=limit)


if __name__ == "__main__":
    num_classes = 4
    embed_dim = 32
    num_total_nodes = 64
    batch_nodes = 8

    root = jax.random.PRNGKey(0)
    k_w, k_feat, k_nodes = jax.random.split(root, 3)

    # Classifier weight: nn.Parameter(num_classes, embed_dim) with xavier init.
    weight = xavier_uniform(k_w, (num_classes, embed_dim))

    # Synthetic deterministic encoder: embedding table; enc.forward(nodes) is a
    # row gather producing (N, embed_dim) — fused into the kernel via DMA.
    feat_table = jax.random.normal(k_feat, (num_total_nodes, embed_dim), jnp.float32)
    nodes = jax.random.randint(
        k_nodes, (batch_nodes,), 0, num_total_nodes, dtype=jnp.int32
    )

    scores = catm_hgn_forward(nodes, feat_table, weight)
    jax.block_until_ready(scores)

    # Correctness check vs. plain-JAX reference of the PyTorch forward.
    embeds_ref = feat_table[nodes]
    ref = (weight @ embeds_ref.T).T
    assert scores.shape == (batch_nodes, num_classes)
    assert jnp.allclose(scores, ref, atol=1e-5, rtol=1e-5)

    print("KERNEL_OK")
</pallas_src>

<mosaic_0001>
module attributes {stable_mosaic.version = 11 : i64} {
  func.func @_catm_hgn_kernel(%arg0: i32, %arg1: memref<8xi32, #tpu.memory_space<smem>>, %arg2: memref<64x32xf32, #tpu.memory_space<any>>, %arg3: memref<32x128xf32, #tpu.memory_space<vmem>>, %arg4: memref<8x128xf32, #tpu.memory_space<vmem>>, %arg5: memref<8x32xf32, #tpu.memory_space<vmem>>, %arg6: memref<8x!tpu.dma_semaphore, #tpu.memory_space<semaphore_mem>>) attributes {dimension_semantics = [#tpu.dimension_semantics<parallel>], iteration_bounds = array<i64: 1>, scalar_prefetch = 1 : i64, scratch_operands = 2 : i64, tpu.core_type = #tpu.core_type<tc>, window_params = [{}, {pipeline_mode = #tpu.pipeline_mode<synchronous>, transform_indices = @transform_1, window_bounds = array<i64: 32, 128>}, {transform_indices = @transform_2, window_bounds = array<i64: 8, 128>}]} {
    %c0_i32 = arith.constant 0 : i32
    %c8_i32 = arith.constant 8 : i32
    %0 = arith.addi %c0_i32, %c8_i32 : i32
    %c1_i32 = arith.constant 1 : i32
    scf.for %arg7 = %c0_i32 to %0 step %c1_i32  : i32 {
      %c1_i32_10 = arith.constant 1 : i32
      %6 = arith.muli %arg7, %c1_i32_10 : i32
      %c0_i32_11 = arith.constant 0 : i32
      %7 = arith.addi %c0_i32_11, %6 : i32
      %c8_i32_12 = arith.constant 8 : i32
      %8 = arith.muli %arg0, %c8_i32_12 : i32
      %9 = arith.addi %8, %7 : i32
      %10 = arith.index_cast %9 : i32 to index
      %11 = memref.load %arg1[%10] : memref<8xi32, #tpu.memory_space<smem>>
      %c0_i32_13 = arith.constant 0 : i32
      %12 = tpu.memref_slice %arg2[%11, %c0_i32_13] : memref<64x32xf32, #tpu.memory_space<any>> -> memref<1x32xf32, #tpu.memory_space<any>>
      %c0_i32_14 = arith.constant 0 : i32
      %13 = tpu.memref_slice %arg5[%7, %c0_i32_14] : memref<8x32xf32, #tpu.memory_space<vmem>> -> memref<1x32xf32, #tpu.memory_space<vmem>>
      %14 = tpu.memref_slice %arg6[%7] : memref<8x!tpu.dma_semaphore, #tpu.memory_space<semaphore_mem>> -> memref<1x!tpu.dma_semaphore, #tpu.memory_space<semaphore_mem>>
      %15 = tpu.memref_squeeze %14 : memref<1x!tpu.dma_semaphore, #tpu.memory_space<semaphore_mem>> -> memref<!tpu.dma_semaphore, #tpu.memory_space<semaphore_mem>>
      tpu.enqueue_dma source(%12 : memref<1x32xf32, #tpu.memory_space<any>>) target(%13 : memref<1x32xf32, #tpu.memory_space<vmem>>) target_semaphore(%15 : memref<!tpu.dma_semaphore, #tpu.memory_space<semaphore_mem>>)
    }
    %c8_i32_0 = arith.constant 8 : i32
    %c0_i32_1 = arith.constant 0 : i32
    %c8_i32_2 = arith.constant 8 : i32
    %1 = arith.addi %c0_i32_1, %c8_i32_2 : i32
    %c1_i32_3 = arith.constant 1 : i32
    scf.for %arg7 = %c0_i32_1 to %1 step %c1_i32_3  : i32 {
      %c1_i32_10 = arith.constant 1 : i32
      %6 = arith.muli %arg7, %c1_i32_10 : i32
      %c0_i32_11 = arith.constant 0 : i32
      %7 = arith.addi %c0_i32_11, %6 : i32
      %c0_i32_12 = arith.constant 0 : i32
      %c0_i32_13 = arith.constant 0 : i32
      %8 = tpu.memref_slice %arg2[%c0_i32_12, %c0_i32_13] : memref<64x32xf32, #tpu.memory_space<any>> -> memref<1x32xf32, #tpu.memory_space<any>>
      %c0_i32_14 = arith.constant 0 : i32
      %9 = tpu.memref_slice %arg5[%7, %c0_i32_14] : memref<8x32xf32, #tpu.memory_space<vmem>> -> memref<1x32xf32, #tpu.memory_space<vmem>>
      %10 = tpu.memref_slice %arg6[%7] : memref<8x!tpu.dma_semaphore, #tpu.memory_space<semaphore_mem>> -> memref<1x!tpu.dma_semaphore, #tpu.memory_space<semaphore_mem>>
      %11 = tpu.memref_squeeze %10 : memref<1x!tpu.dma_semaphore, #tpu.memory_space<semaphore_mem>> -> memref<!tpu.dma_semaphore, #tpu.memory_space<semaphore_mem>>
      tpu.wait_dma2 semaphore(%11 : memref<!tpu.dma_semaphore, #tpu.memory_space<semaphore_mem>>) src(%8 : memref<1x32xf32, #tpu.memory_space<any>>) dst(%9 : memref<1x32xf32, #tpu.memory_space<vmem>>)
    }
    %c8_i32_4 = arith.constant 8 : i32
    %c0 = arith.constant 0 : index
    %c0_5 = arith.constant 0 : index
    %2 = vector.load %arg5[%c0, %c0_5] : memref<8x32xf32, #tpu.memory_space<vmem>>, vector<8x32xf32>
    %c0_6 = arith.constant 0 : index
    %c0_7 = arith.constant 0 : index
    %3 = vector.load %arg3[%c0_6, %c0_7] : memref<32x128xf32, #tpu.memory_space<vmem>>, vector<32x128xf32>
    %cst = arith.constant dense<0.000000e+00> : vector<8x128xf32>
    %4 = tpu.matmul %2, %3, %cst {dimension_numbers = #tpu.dot_dimension_numbers<[1], [0], [0], [1], [0, 0, 1, 1], [], []>} : vector<8x32xf32>, vector<32x128xf32>, vector<8x128xf32> -> vector<8x128xf32>
    %c0_8 = arith.constant 0 : index
    %c0_9 = arith.constant 0 : index
    %5 = vector.load %arg4[%c0_8, %c0_9] : memref<8x128xf32, #tpu.memory_space<vmem>>, vector<8x128xf32>
    tpu.vector_store %arg4[%c0_8, %c0_9], %4 {strides = array<i32>} : memref<8x128xf32, #tpu.memory_space<vmem>>, vector<8x128xf32>,
    return
  }
  func.func @transform_1(%arg0: i32, %arg1: memref<8xi32, #tpu.memory_space<smem>>) -> (i32, i32) {
    %c0_i32 = arith.constant 0 : i32
    %c0_i32_0 = arith.constant 0 : i32
    %c0_i32_1 = arith.constant 0 : i32
    return %c0_i32, %c0_i32_0 : i32, i32
  }
  func.func @transform_2(%arg0: i32, %arg1: memref<8xi32, #tpu.memory_space<smem>>) -> (i32, i32) {
    %c0_i32 = arith.constant 0 : i32
    %c0_i32_0 = arith.constant 0 : i32
    return %arg0, %c0_i32 : i32, i32
  }
}

</mosaic_0001>

<bundles_post_ra>
// kernel: tpu_custom_call.1
= control target key start
LH: loop header
LB: loop body
LE: loop exit
PB: predicated region body
PF: predicated region fallthrough
CT: control target
= control target key end

     0   :  { %s419_s0 = inlined_call_operand.vmem [shape: s32[8], index: 0, kind: input, shape index: {}]   ;;  %s420_s1 = inlined_call_operand.vmem [shape: f32[64,32], index: 1, kind: input, shape index: {}]   ;;  %s421_s2 = inlined_call_operand.vmem [shape: f32[32,128], index: 2, kind: input, shape index: {}]   ;;  %s422_s3 = inlined_call_operand.hbm [shape: f32[8,128], index: 3, kind: output, shape index: {}]  }
   0x1   :  { %s8_s14 = sshll.u32 %s419_s0, 4  ;;  %s9_s14 = int_to_ptr.vmem [resolvable:$true] %s8_s14 }
   0x2   :  { %s308_s15 = scalar_lea.vmem %s9_s14, 16  ;;  %p313_p1 = scmp.lt.s32.totalorder %s9_s14, %s9_s14 }
   0x3   :  { %p309_p0 = scmp.ne.s32.totalorder %s9_s14, %s308_s15  ;;  %p314_p2 = scmp.lt.s32.totalorder %s308_s15, %s308_s15 }
   0x5   :  { %p315_p3 = por %p314_p2, %p313_p1 }
   0x7   :  { %p316_p4 = pnand %p315_p3, %p309_p0 }
   0x9   :  { %319 = shalt.err (!%p316_p4)  }
   0xa   :  { %s364_s16 = smov [#allocation5]  }
   0xb   :  { %11 = dma.vmem_to_smem %s9_s14, 16, %s364_s16, [#allocation4] }
   0xc   :  { %350 = dma.done.wait [#allocation4], 16 }
   0xd   :  { %351 = vsyncadd [#allocation4], 4294967280 }
   0xe   :  { %13 = sfence }
   0xf   :  { %14 = vsyncpa [#allocation7], 0  ;;  %s356_s17 = smov 0  }
  0x10 LB: > { %s25_s18 = sld [smem:[#allocation5 + %s358_s17]]  ;;  %s27_s21 = scalar_lea.vmem [#allocation2], %s358_s17  ;;  %s358_s17 = sphi %s356_s17, %s22_s17  }
  0x11   : > { %s28_s22 = scalar_lea.sflag [#allocation3], %s358_s17 }
  0x16   : > { %s26_s20 = scalar_lea.vmem %s420_s1, %s25_s18 }
  0x17   : > { %v46_v0 = vld [vmem:[%s26_s20] sm:$0x1] }
  0x18   : > { %47 = vst [vmem:[%s27_s21] sm:$0x1] %v46_v0 }
  0x19   : > { %72 = vsyncadd %s28_s22, 16  ;;  %s22_s17 = sadd.s32 1, %s358_s17  }
  0x1a   : > { %p19_p5 = scmp.ge.s32.totalorder %s22_s17, 8  }
  0x1b   :  { %s360_s23 = smov (%p19_p5), 0  }
  0x1c   :  { %21 = sbr.rel (!%p19_p5) target bundleno = 16 (0x10), region = 89 }
  0x23 LB: > { %s79_s24 = scalar_lea.sflag [#allocation3], %s362_s23  ;;  %s362_s23 = sphi %s360_s23, %s78_s23  }
  0x24   : > { %352 = dma.done.wait %s79_s24, 16 }
  0x25   : > { %353 = vsyncadd %s79_s24, 4294967280  ;;  %s78_s23 = sadd.s32 1, %s362_s23  }
  0x26   : > { %p75_p6 = scmp.ge.s32.totalorder %s78_s23, 8  }
  0x27   :  { %v84_v1 = vld [vmem:[%s421_s2] sm:$0xff] (%p75_p6)  ;;  %v85_v2 = vld [vmem:[%s421_s2 + $0x8] sm:$0xff] (%p75_p6)  ;;  %v86_v3 = vld [vmem:[%s421_s2 + $0x10] sm:$0xff] (%p75_p6)  ;;  %v365_v4 = vmov (%p75_p6), 0.0|0.0   ;;  %vm366_vm0 = vmmov (%p75_p6), 0   ;;  %v367_v7 = vmov (%p75_p6), 0.0  }
  0x28   :  { %77 = sbr.rel (!%p75_p6) target bundleno = 35 (0x23), region = 100  ;;  %281 = vmatprep.subr.bf16.mxu0 (%p75_p6), %v365_v4  ;;  %v282_v5 = vpack.c.bf16 (%p75_p6), %v85_v2, %v84_v1  ;;  %v87_v6 = vld [vmem:[%s421_s2 + $0x18] sm:$0xff] (%p75_p6)  ;;  %278 = vmatprep.mubr.msk.f32.mxu0 (%p75_p6), %vm366_vm0, %v367_v7  ;;  %v83_v9 = vld [vmem:[#allocation2] sm:$0xff] (%p75_p6)  ;;  %vm88_vm1 = vcmask (%p75_p6), 261120   ;;  %s368_s5 = smov (%p75_p6), [#allocation6]  }
  0x29   :  { %v285_v8 = vpack.c.bf16 (%p75_p6), %v87_v6, %v86_v3  ;;  %s169_s6 = sshll.u32 (%p75_p6), %s368_s5, 4  ;;  %s170_s6 = int_to_ptr.vmem [resolvable:$true] %s169_s6 }
  0x2a   :  { %283 = vmatpush3.bf16.msra.mxu0 (%p75_p6), %v282_v5  ;;  %s320_s7 = scalar_lea.vmem (%p75_p6), %s170_s6, 128  ;;  %p325_p8 = scmp.lt.s32.totalorder (%p75_p6), %s170_s6, %s170_s6 }
  0x2b   :  { %284 = vmatprep.subr.bf16.mxu0 (%p75_p6), %v365_v4  ;;  %p321_p7 = scmp.ne.s32.totalorder (%p75_p6), %s170_s6, %s320_s7  ;;  %p326_p9 = scmp.lt.s32.totalorder (%p75_p6), %s320_s7, %s320_s7 }
  0x2d   :  { %p327_p10 = por (%p75_p6), %p326_p9, %p325_p8 }
  0x2e   :  { %286 = vmatpush3.bf16.msra.mxu0 (%p75_p6), %v285_v8 }
  0x2f   :  { %p328_p11 = pnand %p327_p10, %p321_p7 }
  0x31   :  { %279 = vmatmul.mubr.msk.f32.vlgmr.msra.gmra.mrb[0].mxu0 %vm88_vm1, %v83_v9 }
 0x104   :  { %v158_v10 = vpop.f32.mrb[0].mxu0 }
 0x105   :  { %162 = vst [vmem:[#allocation6] sm:$0xff] %v158_v10  ;;  %v280_v11 = vpop.f32.mrb[1].mxu0 }
 0x106   :  { %331 = shalt.err (!%p328_p11)
}
 0x107   :  { %s332_s9 = scalar_lea.hbm %s422_s3, 128 }
 0x108   :  { %p333_p12 = scmp.ne.s32.totalorder %s422_s3, %s332_s9  ;;  %p336_p13 = scmp.lt.u32.totalorder %s332_s9, %s422_s3 }
 0x10a   :  { %p338_p0 = pnand %p336_p13, %p333_p12 }
 0x10c   :  { %341 = shalt.err (!%p338_p0)
}
 0x10d   :  { %172 = dma.vmem_to_hbm [thread:$0]  %s170_s6, 128, %s422_s3, [#allocation7]  }
 0x10e   :  { %354 = dma.done.wait [#allocation7], 128  }
 0x10f   :  { %355 = vsyncadd [#allocation7], 4294967168 }
 0x110   :  { %176 = vsyncpa [#allocation7], 1 }
 0x111   :  { %177 = vsyncmov [#allocation3] }
 0x114   :  { %s178_s16 = vpop.sfrf %177 }
 0x115   :  { %p257_p1 = scmp.ne.s32.totalorder %s178_s16, 0 }
 0x117   :  { %182 = shalt.err (%p257_p1)  }
 0x118   :  { %184 = vsyncmov [#allocation3 + $0x1] }
 0x11b   :  { %s185_s17 = vpop.sfrf %184 }
 0x11c   :  { %p258_p2 = scmp.ne.s32.totalorder %s185_s17, 0 }
 0x11e   :  { %189 = shalt.err (%p258_p2)  }
 0x11f   :  { %191 = vsyncmov [#allocation3 + $0x2] }
 0x122   :  { %s192_s18 = vpop.sfrf %191 }
 0x123   :  { %p259_p3 = scmp.ne.s32.totalorder %s192_s18, 0 }
 0x125   :  { %196 = shalt.err (%p259_p3)  }
 0x126   :  { %198 = vsyncmov [#allocation3 + $0x3] }
 0x129   :  { %s199_s0 = vpop.sfrf %198 }
 0x12a   :  { %p260_p4 = scmp.ne.s32.totalorder %s199_s0, 0 }
 0x12c   :  { %203 = shalt.err (%p260_p4)  }
 0x12d   :  { %205 = vsyncmov [#allocation3 + $0x4] }
 0x130   :  { %s206_s3 = vpop.sfrf %205 }
 0x131   :  { %p261_p5 = scmp.ne.s32.totalorder %s206_s3, 0 }
 0x133   :  { %210 = shalt.err (%p261_p5)  }
 0x134   :  { %212 = vsyncmov [#allocation3 + $0x5] }
 0x137   :  { %s213_s19 = vpop.sfrf %212 }
 0x138   :  { %p262_p6 = scmp.ne.s32.totalorder %s213_s19, 0 }
 0x13a   :  { %217 = shalt.err (%p262_p6)  }
 0x13b   :  { %219 = vsyncmov [#allocation3 + $0x6] }
 0x13e   :  { %s220_s20 = vpop.sfrf %219 }
 0x13f   :  { %p263_p7 = scmp.ne.s32.totalorder %s220_s20, 0 }
 0x141   :  { %224 = shalt.err (%p263_p7)  }
 0x142   :  { %226 = vsyncmov [#allocation3 + $0x7] }
 0x145   :  { %s227_s21 = vpop.sfrf %226 }
 0x146   :  { %p264_p8 = scmp.ne.s32.totalorder %s227_s21, 0 }
 0x148   :  { %231 = shalt.err (%p264_p8)  }

</bundles_post_ra>
